<compile_context>
chip_gen: v5e
topology: v5e:2x2
jax: 0.10.0
libtpu: 0.0.40
codegen_flags: <defaults>
</compile_context>

<pallas_src>
import jax
import jax.numpy as jnp
from jax.experimental import pallas as pl
from jax.experimental.pallas import tpu as pltpu

LANES = 1024        # lane-dense slab width (large multiple of 128 -> unmasked vst)
MAX_TILE_R = 512    # 512 x 1024 f32 = 2 MiB per block


def _round_up(a, b):
    return (a + b - 1) // b * b


def _sublane_multiple(dtype):
    itemsize = jnp.dtype(dtype).itemsize
    return {4: 8, 2: 16, 1: 32}.get(itemsize, 8)


def _slab_layout(n, dtype):
    """Choose (rows_padded, tile_r) for a flat array of n elements."""
    sub = _sublane_multiple(dtype)
    rows = -(-n // LANES)  # cdiv
    if rows >= MAX_TILE_R:
        tile_r = MAX_TILE_R
    else:
        tile_r = _round_up(max(rows, 1), sub)
    rows_padded = _round_up(rows, tile_r)
    return rows_padded, tile_r


def _to_slab(x, rows_padded):
    flat = x.reshape(-1)
    pad = rows_padded * LANES - flat.shape[0]
    if pad:
        flat = jnp.pad(flat, (0, pad))
    return flat.reshape(rows_padded, LANES)


# -----------------------------------------------------------------------------
# Kernel 1: sum(|x|) reduction (used for LSQ alpha initialization)
# -----------------------------------------------------------------------------
def _abs_sum_kernel(x_ref, o_ref, acc_ref):
    i = pl.program_id(0)

    @pl.when(i == 0)
    def _():
        acc_ref[...] = jnp.zeros_like(acc_ref)

    # Pure VALU element-wise accumulation every step; no cross-lane work here.
    acc_ref[...] += jnp.abs(x_ref[...].astype(jnp.float32))

    @pl.when(i == pl.num_programs(0) - 1)
    def _():
        o_ref[0] = jnp.sum(acc_ref[...])


def abs_mean_pallas(x):
    n = x.size
    rows_padded, tile_r = _slab_layout(n, x.dtype)
    x2d = _to_slab(x, rows_padded)
    total = pl.pallas_call(
        _abs_sum_kernel,
        out_shape=jax.ShapeDtypeStruct((1,), jnp.float32),
        grid_spec=pltpu.PrefetchScalarGridSpec(
            num_scalar_prefetch=0,
            grid=(rows_padded // tile_r,),
            in_specs=[pl.BlockSpec((tile_r, LANES), lambda i: (i, 0))],
            out_specs=pl.BlockSpec(memory_space=pltpu.MemorySpace.SMEM),
            scratch_shapes=[pltpu.VMEM((tile_r, LANES), jnp.float32)],
        ),
        compiler_params=pltpu.CompilerParams(
            dimension_semantics=("arbitrary",),
            vmem_limit_bytes=32 * 1024 * 1024,
        ),
    )(x2d)
    return total[0] / jnp.float32(n)


# -----------------------------------------------------------------------------
# Kernel 2: elementwise LSQ quantization
# -----------------------------------------------------------------------------
def _quant_round_kernel(p_ref, x_ref, o_ref):
    inv_alpha = p_ref[0]
    alpha = p_ref[1]
    qn = p_ref[2]
    qp = p_ref[3]
    off = p_ref[4]

    x = x_ref[...].astype(jnp.float32)
    dq = jnp.clip((x + off) * inv_alpha, qn, qp)
    o_ref[...] = (jnp.round(dq) * alpha - off).astype(o_ref.dtype)


def _quant_noise_kernel(p_ref, x_ref, n_ref, o_ref):
    inv_alpha = p_ref[0]
    alpha = p_ref[1]
    qn = p_ref[2]
    qp = p_ref[3]
    off = p_ref[4]

    x = x_ref[...].astype(jnp.float32)
    data = (x + off) * inv_alpha + n_ref[...]
    o_ref[...] = (jnp.clip(data, qn, qp) * alpha - off).astype(o_ref.dtype)


def quantize_pallas(x, alpha, qn, qp, offset, noise_key, add_noise):
    orig_shape = x.shape
    orig_dtype = x.dtype
    n = x.size
    rows_padded, tile_r = _slab_layout(n, orig_dtype)
    x2d = _to_slab(x, rows_padded)

    alpha = jnp.asarray(alpha, jnp.float32).reshape(())
    params = jnp.stack(
        [
            1.0 / alpha,                                    # divide -> multiply in-kernel
            alpha,
            jnp.asarray(qn, jnp.float32).reshape(()),
            jnp.asarray(qp, jnp.float32).reshape(()),
            jnp.asarray(offset, jnp.float32).reshape(()),
        ]
    )

    block = pl.BlockSpec((tile_r, LANES), lambda i: (i, 0))
    smem = pl.BlockSpec(memory_space=pltpu.MemorySpace.SMEM)
    grid = (rows_padded // tile_r,)
    cparams = pltpu.CompilerParams(
        dimension_semantics=("parallel",),       # independent blocks; shards TCs on v7x
        vmem_limit_bytes=32 * 1024 * 1024,
    )

    if add_noise:
        # qnoise_make: uniform(-0.5, 0.5) pseudo-quantization noise.
        # TODO(synk): on real TPU HW this could be generated in-kernel with
        # pltpu.prng_random_bits (saves one HBM read), but that primitive has
        # no CPU/interpret-mode lowering.
        noise = jax.random.uniform(noise_key, (rows_padded, LANES), jnp.float32) - 0.5
        out2d = pl.pallas_call(
            _quant_noise_kernel,
            out_shape=jax.ShapeDtypeStruct((rows_padded, LANES), orig_dtype),
            grid_spec=pltpu.PrefetchScalarGridSpec(
                num_scalar_prefetch=0,
                grid=grid,
                in_specs=[smem, block, block],
                out_specs=block,
            ),
            compiler_params=cparams,
        )(params, x2d, noise)
    else:
        out2d = pl.pallas_call(
            _quant_round_kernel,
            out_shape=jax.ShapeDtypeStruct((rows_padded, LANES), orig_dtype),
            grid_spec=pltpu.PrefetchScalarGridSpec(
                num_scalar_prefetch=0,
                grid=grid,
                in_specs=[smem, block],
                out_specs=block,
            ),
            compiler_params=cparams,
        )(params, x2d)

    out = out2d.reshape(-1)
    if rows_padded * LANES != n:
        out = out[:n]
    return out.reshape(orig_shape)


# -----------------------------------------------------------------------------
# JAX/Pallas port of the PyTorch NIPQ Quantizer (forward semantics only)
# -----------------------------------------------------------------------------
class Quantizer:
    def __init__(self, sym, noise, offset=0.0, is_stochastic=True, is_discretize=True):
        # deterministic parameter init, matching nn.Module __init__
        self.bit = jnp.zeros((1,), jnp.float32)    # Parameter: zeros(1)
        self.alpha = jnp.ones((1,), jnp.float32)   # Parameter: fill_(1)
        self.sym = sym
        self.offset = float(offset)
        self.noise = noise
        self.is_stochastic = is_stochastic
        self.is_discretize = is_discretize
        self.init_state = 0                        # buffer init_state = 0

    def _q_range(self, bit_r):
        if self.sym:
            qp = 2.0 ** (bit_r - 1.0) - 1.0
            qn = -(2.0 ** (bit_r - 1.0))
        else:
            qp = 2.0 ** bit_r - 1.0
            qn = jnp.zeros((1,), jnp.float32)
        return qn, qp

    def __call__(self, x, key, is_training=True):
        kb, kq = jax.random.split(key)

        bit = 2.0 + jax.nn.sigmoid(self.bit) * 12.0
        if is_training and self.noise and self.is_stochastic:
            bit = bit + jax.random.uniform(kb, (1,), jnp.float32) - 0.5
        if (not is_training) or self.is_discretize:
            bit = jnp.round(bit)  # STE: forward value is the rounded bit
        bit_r = jnp.round(bit)

        if is_training and self.init_state == 0:
            # lsq_init: alpha = mean(|x|) * 2 / sqrt(Qp)   (Pallas reduction)
            _, qp_init = self._q_range(bit_r)
            mean_abs = abs_mean_pallas(x)
            self.alpha = (mean_abs * 2.0 / jnp.sqrt(qp_init)).reshape(1)
            self.init_state = 1

        qn, qp = self._q_range(bit_r)
        add_noise = bool(is_training and self.noise)
        return quantize_pallas(
            x, self.alpha[0], qn.reshape(()), qp.reshape(()), self.offset, kq, add_noise
        )


if __name__ == "__main__":
    key = jax.random.PRNGKey(0)
    kx, kcall1, kcall2 = jax.random.split(key, 3)

    B, C, H, W = 2, 4, 16, 16
    x = jax.random.normal(kx, (B, C, H, W), dtype=jnp.float32)

    q = Quantizer(sym=True, noise=True, offset=0.0,
                  is_stochastic=True, is_discretize=True)

    # training forward (initializes alpha, uses noisy quantization path)
    y_train = q(x, kcall1, is_training=True)
    y_train = jax.block_until_ready(y_train)

    # eval forward (deterministic LSQ round path)
    y_eval = q(x, kcall2, is_training=False)
    y_eval = jax.block_until_ready(y_eval)

    assert y_train.shape == x.shape and y_eval.shape == x.shape
    assert bool(jnp.all(jnp.isfinite(y_train))) and bool(jnp.all(jnp.isfinite(y_eval)))
    # eval path must land exactly on the quantization grid: y/alpha integral
    grid_vals = y_eval / q.alpha[0]
    assert bool(jnp.max(jnp.abs(grid_vals - jnp.round(grid_vals))) < 1e-3)

    print("KERNEL_OK")
</pallas_src>

<mosaic_0001>
module attributes {stable_mosaic.version = 11 : i64} {
  func.func @_abs_sum_kernel(%arg0: i32, %arg1: memref<8x1024xf32, #tpu.memory_space<vmem>>, %arg2: memref<1xf32, #tpu.memory_space<smem>>, %arg3: memref<8x1024xf32, #tpu.memory_space<vmem>>) attributes {dimension_semantics = [#tpu.dimension_semantics<arbitrary>], iteration_bounds = array<i64: 1>, scalar_prefetch = 0 : i64, scratch_operands = 1 : i64, tpu.core_type = #tpu.core_type<tc>, window_params = [{transform_indices = @transform_0, window_bounds = array<i64: 8, 1024>}, {transform_indices = @transform_1, window_bounds = array<i64: 1>}]} {
    %c0_i32 = arith.constant 0 : i32
    %0 = arith.cmpi eq, %arg0, %c0_i32 : i32
    %1 = arith.extui %0 : i1 to i32
    %c0_i32_0 = arith.constant 0 : i32
    %2 = arith.cmpi ne, %1, %c0_i32_0 : i32
    scf.if %2 {
      %cst = arith.constant 0.000000e+00 : f32
      %11 = vector.broadcast %cst : f32 to vector<8x1024xf32>
      %c0_8 = arith.constant 0 : index
      %c0_9 = arith.constant 0 : index
      %12 = vector.load %arg3[%c0_8, %c0_9] : memref<8x1024xf32, #tpu.memory_space<vmem>>, vector<8x1024xf32>
      tpu.vector_store %arg3[%c0_8, %c0_9], %11 {strides = array<i32>} : memref<8x1024xf32, #tpu.memory_space<vmem>>, vector<8x1024xf32>,
    } else {
    }
    %c0 = arith.constant 0 : index
    %c0_1 = arith.constant 0 : index
    %3 = vector.load %arg3[%c0, %c0_1] : memref<8x1024xf32, #tpu.memory_space<vmem>>, vector<8x1024xf32>
    %c0_2 = arith.constant 0 : index
    %c0_3 = arith.constant 0 : index
    %4 = vector.load %arg1[%c0_2, %c0_3] : memref<8x1024xf32, #tpu.memory_space<vmem>>, vector<8x1024xf32>
    %5 = math.absf %4 : vector<8x1024xf32>
    %6 = arith.addf %3, %5 : vector<8x1024xf32>
    %c0_4 = arith.constant 0 : index
    %c0_5 = arith.constant 0 : index
    %7 = vector.load %arg3[%c0_4, %c0_5] : memref<8x1024xf32, #tpu.memory_space<vmem>>, vector<8x1024xf32>
    tpu.vector_store %arg3[%c0_4, %c0_5], %6 {strides = array<i32>} : memref<8x1024xf32, #tpu.memory_space<vmem>>, vector<8x1024xf32>,
    %c0_i32_6 = arith.constant 0 : i32
    %8 = arith.cmpi eq, %arg0, %c0_i32_6 : i32
    %9 = arith.extui %8 : i1 to i32
    %c0_i32_7 = arith.constant 0 : i32
    %10 = arith.cmpi ne, %9, %c0_i32_7 : i32
    scf.if %10 {
      %c0_8 = arith.constant 0 : index
      %c0_9 = arith.constant 0 : index
      %11 = vector.load %arg3[%c0_8, %c0_9] : memref<8x1024xf32, #tpu.memory_space<vmem>>, vector<8x1024xf32>
      %12 = vector.shape_cast %11 : vector<8x1024xf32> to vector<1x8x1024xf32>
      %cst = arith.constant dense<0.000000e+00> : vector<1xf32>
      %13 = vector.multi_reduction <add>, %12, %cst [1, 2] : vector<1x8x1024xf32> to vector<1xf32>
      %14 = vector.shape_cast %13 : vector<1xf32> to vector<1x1x1xf32>
      %15 = vector.extract %14[0, 0, 0] : f32 from vector<1x1x1xf32>
      %c0_10 = arith.constant 0 : index
      %16 = memref.load %arg2[%c0_10] : memref<1xf32, #tpu.memory_space<smem>>
      memref.store %15, %arg2[%c0_10] : memref<1xf32, #tpu.memory_space<smem>>
    } else {
    }
    return
  }
  func.func @transform_0(%arg0: i32) -> (i32, i32) {
    %c0_i32 = arith.constant 0 : i32
    %c0_i32_0 = arith.constant 0 : i32
    return %arg0, %c0_i32 : i32, i32
  }
  func.func @transform_1(%arg0: i32) -> i32 {
    %c0_i32 = arith.constant 0 : i32
    %c0_i32_0 = arith.constant 0 : i32
    return %c0_i32 : i32
  }
}

</mosaic_0001>

<bundles_post_ra>
// kernel: tpu_custom_call.1
= control target key start
LH: loop header
LB: loop body
LE: loop exit
PB: predicated region body
PF: predicated region fallthrough
CT: control target
= control target key end

     0   :  { %6 = vsyncpa [#allocation4], 0  ;;  %s182_s0 = inlined_call_operand.hbm [shape: f32[8,1024], index: 0, kind: input, shape index: {}]   ;;  %s183_s1 = inlined_call_operand.hbm [shape: f32[1], index: 1, kind: output, shape index: {}]  }
   0x1   :  { %7 = vsyncpa [#allocation5], 0  ;;  %s13_s8 = sshll.u32 %s182_s0, 4  ;;  %s164_s9 = smov [#allocation3]   ;;  %s14_s8 = int_to_ptr.hbm [resolvable:$true] %s13_s8 }
   0x2   :  { %s15_s10 = sshll.u32 %s164_s9, 4  ;;  %s16_s10 = int_to_ptr.vmem [resolvable:$true] %s15_s10 }
   0x3   :  { %18 = dma.hbm_to_vmem [thread:$0]  %s14_s8, 1024, %s16_s10, [#allocation4]  }
   0x4   :  { %160 = dma.done.wait [#allocation4], 1024  }
   0x5   :  { %161 = vsyncadd [#allocation4], 4294966272  ;;  %v43_v0 = vld [vmem:[#allocation3] sm:$0xff]  ;;  %v44_v1 = vld [vmem:[#allocation3 + $0x8] sm:$0xff]  ;;  %s109_s12 = sshll.u32 %s183_s1, 4  ;;  %s165_s14 = smov [#allocation6]   ;;  %s110_s12 = int_to_ptr.hbm [resolvable:$true] %s109_s12 }
   0x6   :  { %v45_v2 = vld [vmem:[#allocation3 + $0x10] sm:$0xff]  ;;  %v46_v3 = vld [vmem:[#allocation3 + $0x18] sm:$0xff]  ;;  %v51_v4 = vand.u32 2147483647, %v43_v0  ;;  %v52_v5 = vand.u32 2147483647, %v44_v1 }
   0x7   :  { %v53_v6 = vand.u32 2147483647, %v45_v2  ;;  %v47_v7 = vld [vmem:[#allocation3 + $0x20] sm:$0xff]  ;;  %v54_v8 = vand.u32 2147483647, %v46_v3  ;;  %v48_v10 = vld [vmem:[#allocation3 + $0x28] sm:$0xff] }
   0x8   :  { %v86_v9 = vadd.f32 %v52_v5, %v51_v4  ;;  %v55_v11 = vand.u32 2147483647, %v47_v7  ;;  %v49_v13 = vld [vmem:[#allocation3 + $0x30] sm:$0xff]  ;;  %v56_v14 = vand.u32 2147483647, %v48_v10  ;;  %v50_v16 = vld [vmem:[#allocation3 + $0x38] sm:$0xff] }
   0x9   :  { %v57_v17 = vand.u32 2147483647, %v49_v13  ;;  %v58_v19 = vand.u32 2147483647, %v50_v16 }
   0xa   :  { %v87_v12 = vadd.f32 %v86_v9, %v53_v6 }
   0xc   :  { %v88_v15 = vadd.f32 %v87_v12, %v54_v8 }
   0xe   :  { %v89_v18 = vadd.f32 %v88_v15, %v55_v11 }
  0x10   :  { %v90_v20 = vadd.f32 %v89_v18, %v56_v14 }
  0x12   :  { %v91_v21 = vadd.f32 %v90_v20, %v57_v17 }
  0x14   :  { %v92_v22 = vadd.f32 %v91_v21, %v58_v19 }
  0x16   :  { %93 = vadd.xlane.f32.xlu0 %v92_v22 }
  0x89   :  { %v94_v23 = vpop.xlane.xlu0 %93 }
  0x8a   :  { %v95_v24 = vrot.slane %v94_v23, 4 }
  0x8c   :  { %v96_v25 = vadd.f32 %v95_v24, %v94_v23 }
  0x8e   :  { %v97_v26 = vrot.slane %v96_v25, 2 }
  0x90   :  { %v98_v27 = vadd.f32 %v97_v26, %v96_v25 }
  0x92   :  { %v99_v28 = vrot.slane %v98_v27, 1 }
  0x94   :  { %v100_v29 = vadd.f32 %v99_v28, %v98_v27 }
  0x96   :  { %120 = vpush %v100_v29 }
  0xc7   :  { %s121_s13 = spop %120 }
  0xc8   :  { %103 = sst [smem:[#allocation6]] %s121_s13 }
  0xc9   :  { %112 = dma.smem_to_hbm %s165_s14, 16, %s110_s12, [#allocation5]  }
  0xca   :  { %162 = dma.done.wait [#allocation5], 16  }
  0xcb   :  { %163 = vsyncadd [#allocation5], 4294967280 }
  0xcc   :  { %117 = sfence }
  0xcd   :  { %118 = vsyncpa [#allocation4], 1 }
  0xce   :  { %119 = vsyncpa [#allocation5], 1 }

</bundles_post_ra>
